<compile_context>
chip_gen: v6e
topology: v6e:2x2x1
jax: 0.10.0
libtpu: 0.0.40
codegen_flags: <defaults>
</compile_context>

<pallas_src>
import functools

import jax
import jax.numpy as jnp
from jax import lax
from jax.experimental import pallas as pl
from jax.experimental.pallas import tpu as pltpu


def _round_up(a: int, m: int) -> int:
    return ((a + m - 1) // m) * m


# --------------------------------------------------------------------------- #
# Kernels
# --------------------------------------------------------------------------- #
def _cir_mxu_kernel(x_ref, w_ref, b_ref, o_ref):
    # x_ref: (in, TILE_B)  w_ref: (out, in)  b_ref: (out, 1)  o_ref: (out, TILE_B)
    # y^T[o, b] = sum_k W[o, k] * xT[k, b]  -- single MXU matmul, lane-dense out.
    y_t = lax.dot_general(
        w_ref[...], x_ref[...],
        dimension_numbers=(((1,), (0,)), ((), ())),
        preferred_element_type=jnp.float32,
    )
    o_ref[...] = (y_t + b_ref[...]).astype(o_ref.dtype)


def _cir_vpu_kernel(x_ref, w_ref, b_ref, o_ref, *, in_size, out_size):
    # Tiny-weight path: weight/bias are SMEM scalars (single copy, no pipelining).
    # x_ref: (in, TILE_B) VMEM   w_ref: (out*in,) SMEM   b_ref: (out,) SMEM
    # o_ref: (out, TILE_B) VMEM
    for o in range(out_size):
        row = x_ref[0:1, :] * w_ref[o * in_size + 0]
        for k in range(1, in_size):
            row = row + x_ref[k:k + 1, :] * w_ref[o * in_size + k]
        o_ref[o:o + 1, :] = row + b_ref[o]


# --------------------------------------------------------------------------- #
# Wrappers
# --------------------------------------------------------------------------- #
def fuse_cir_params(w1, b1, w2, b2):
    """linear2(linear1(x)) == x @ (w2 @ w1)^T + (w2 @ b1 + b2) (no activation)."""
    w1 = jnp.asarray(w1, jnp.float32)
    b1 = jnp.asarray(b1, jnp.float32)
    w2 = jnp.asarray(w2, jnp.float32)
    b2 = jnp.asarray(b2, jnp.float32)
    w_fused = w2 @ w1            # (out, in)
    b_fused = w2 @ b1 + b2       # (out,)
    return w_fused, b_fused


def cir_forward_fused(x, w_fused, b_fused, *, tile_b=8192,
                      min_pallas_rows=2048, force_pallas=False):
    """Forward pass with pre-fused parameters.  x: (B, in) -> (B, out) f32."""
    x = jnp.asarray(x, jnp.float32)
    B, in_size = x.shape
    out_size, in_w = w_fused.shape
    assert in_w == in_size

    # Small-batch fast path: one fused XLA matmul beats the pad/transpose/
    # pallas_call dispatch overhead until there is real batch to amortize it.
    if B < min_pallas_rows and not force_pallas:
        return x @ w_fused.T + b_fused

    lane = 128
    # Batch lives on the 128-lane axis (of both x^T blocks and the output).
    tile = min(_round_up(tile_b, lane), _round_up(B, lane))
    tile = max(tile, lane)
    b_pad = _round_up(B, tile)

    # v7x has 2 TensorCores and shards "parallel" grid axes across them: make
    # sure the batch axis has >= 2 steps whenever there are >= 2 lane-tiles.
    if b_pad // tile < 2 and b_pad >= 2 * lane:
        tile = max(lane, ((b_pad // 2) // lane) * lane)
        b_pad = _round_up(B, tile)

    # Padding-aware VMEM estimate (x^T & out tiles double-buffered, fused weight
    # + bias resident); shrink the tile if we would blow a 24 MiB budget.
    in_p8 = _round_up(in_size, 8)
    out_p8 = _round_up(out_size, 8)

    def _vmem_need(t):
        x_buf = in_p8 * t * 4 * 2
        o_buf = out_p8 * t * 4 * 2
        w_buf = out_p8 * _round_up(in_size, lane) * 4 * 2
        bias_buf = out_p8 * lane * 4 * 2
        return x_buf + o_buf + w_buf + bias_buf

    budget = 24 << 20
    while _vmem_need(tile) > budget and tile > lane:
        tile = max(lane, ((tile // 2) // lane) * lane)
        b_pad = _round_up(B, tile)
    vmem_limit = int(min(max(2 * _vmem_need(tile), 4 << 20), 48 << 20))

    # x^T: (in, B_pad) -- batch on the lane axis, contiguous per-row DMA slices.
    x_t = x.T
    if b_pad != B:
        x_t = jnp.pad(x_t, ((0, 0), (0, b_pad - B)))   # zero cols, sliced off below
    grid = (b_pad // tile,)

    small_weight = (in_size <= 8) and (out_size <= 8)
    if small_weight:
        # VPU path: weight/bias as SMEM scalars (single copy), no MXU push/pop.
        kernel = functools.partial(_cir_vpu_kernel,
                                   in_size=in_size, out_size=out_size)
        w_arg = w_fused.reshape(-1)          # (out*in,) f32 scalars in SMEM
        b_arg = b_fused                      # (out,)    f32 scalars in SMEM
        in_specs = [
            pl.BlockSpec((in_size, tile), lambda i: (0, i)),          # x^T tile
            pl.BlockSpec(memory_space=pltpu.MemorySpace.SMEM),        # weight
            pl.BlockSpec(memory_space=pltpu.MemorySpace.SMEM),        # bias
        ]
    else:
        kernel = _cir_mxu_kernel
        w_arg = w_fused
        b_arg = b_fused[:, None]
        in_specs = [
            pl.BlockSpec((in_size, tile), lambda i: (0, i)),          # x^T tile
            pl.BlockSpec((out_size, in_size), lambda i: (0, 0)),      # resident W
            pl.BlockSpec((out_size, 1), lambda i: (0, 0)),            # resident b
        ]

    out_t = pl.pallas_call(
        kernel,
        out_shape=jax.ShapeDtypeStruct((out_size, b_pad), jnp.float32),
        grid_spec=pltpu.PrefetchScalarGridSpec(
            num_scalar_prefetch=0,
            grid=grid,
            in_specs=in_specs,
            out_specs=pl.BlockSpec((out_size, tile), lambda i: (0, i)),  # lane-dense
        ),
        compiler_params=pltpu.CompilerParams(
            dimension_semantics=("parallel",),
            vmem_limit_bytes=vmem_limit,
        ),
    )(x_t, w_arg, b_arg)

    # (out, B_pad) -> (B, out)
    return out_t[:, :B].T


def make_cir_model(w1, b1, w2, b2, **forward_kwargs):
    """Fuse the two linears ONCE and return a jitted forward over x."""
    w_fused, b_fused = fuse_cir_params(w1, b1, w2, b2)

    def fwd(x):
        return cir_forward_fused(x, w_fused, b_fused, **forward_kwargs)

    return jax.jit(fwd)


def cir_model_forward(x, w1, b1, w2, b2, **forward_kwargs):
    """One-shot convenience wrapper (fuses params on every call)."""
    w_fused, b_fused = fuse_cir_params(w1, b1, w2, b2)
    return cir_forward_fused(x, w_fused, b_fused, **forward_kwargs)


def _init_linear_params(key, in_features, out_features):
    # Deterministic init mimicking PyTorch's default uniform(-1/sqrt(in), 1/sqrt(in)).
    kw, kb = jax.random.split(key)
    bound = 1.0 / jnp.sqrt(jnp.float32(in_features))
    w = jax.random.uniform(kw, (out_features, in_features), jnp.float32, -bound, bound)
    b = jax.random.uniform(kb, (out_features,), jnp.float32, -bound, bound)
    return w, b


if __name__ == "__main__":
    key = jax.random.PRNGKey(0)
    k = jax.random.split(key, 7)

    def ref(x, w1, b1, w2, b2):
        return (x @ w1.T + b1) @ w2.T + b2

    # --- Model A: the module's default sizes (input=2, hidden=5, output=1). ---
    in_a, hid_a, out_a = 2, 5, 1
    w1a, b1a = _init_linear_params(k[0], in_a, hid_a)
    w2a, b2a = _init_linear_params(k[1], hid_a, out_a)
    wfa, bfa = fuse_cir_params(w1a, b1a, w2a, b2a)

    # 1) Tiny batch -> fast path (no Pallas dispatch overhead).
    x_small = jax.random.normal(k[2], (8, in_a), jnp.float32)
    y_small = cir_forward_fused(x_small, wfa, bfa)
    jax.block_until_ready(y_small)
    assert y_small.shape == (8, out_a)
    assert jnp.allclose(y_small, ref(x_small, w1a, b1a, w2a, b2a), atol=1e-5, rtol=1e-5)

    # 2) Force the Pallas path (tiny-weight VPU/SMEM kernel) on a batch that pads
    #    to two 128-row lane tiles (exercises padding + multi-step parallel grid).
    x_a = jax.random.normal(k[3], (200, in_a), jnp.float32)
    y_a = cir_forward_fused(x_a, wfa, bfa, force_pallas=True)
    jax.block_until_ready(y_a)
    assert y_a.shape == (200, out_a)
    assert jnp.allclose(y_a, ref(x_a, w1a, b1a, w2a, b2a), atol=1e-5, rtol=1e-5)

    # --- Model B: wider sizes, exercises the MXU kernel path + cached fusion. ---
    in_b, hid_b, out_b = 16, 32, 4
    w1b, b1b = _init_linear_params(k[4], in_b, hid_b)
    w2b, b2b = _init_linear_params(k[5], hid_b, out_b)
    fwd_b = make_cir_model(w1b, b1b, w2b, b2b, force_pallas=True)  # fuses once, jits
    x_b = jax.random.normal(k[6], (256, in_b), jnp.float32)
    y_b = fwd_b(x_b)
    jax.block_until_ready(y_b)
    assert y_b.shape == (256, out_b)
    assert jnp.allclose(y_b, ref(x_b, w1b, b1b, w2b, b2b), atol=1e-4, rtol=1e-3)

    print("KERNEL_OK")
</pallas_src>

<mosaic_0001>
module attributes {stable_mosaic.version = 11 : i64} {
  func.func @_cir_vpu_kernel(%arg0: i32, %arg1: memref<2x128xf32, #tpu.memory_space<vmem>>, %arg2: memref<2xf32, #tpu.memory_space<smem>>, %arg3: memref<1xf32, #tpu.memory_space<smem>>, %arg4: memref<1x128xf32, #tpu.memory_space<vmem>>) attributes {dimension_semantics = [#tpu.dimension_semantics<parallel>], iteration_bounds = array<i64: 2>, scalar_prefetch = 0 : i64, scratch_operands = 0 : i64, tpu.core_type = #tpu.core_type<tc>, window_params = [{transform_indices = @transform_0, window_bounds = array<i64: 2, 128>}, {transform_indices = @transform_1, window_bounds = array<i64: 2>}, {transform_indices = @transform_2, window_bounds = array<i64: 1>}, {transform_indices = @transform_3, window_bounds = array<i64: 1, 128>}]} {
    %c0 = arith.constant 0 : index
    %c0_0 = arith.constant 0 : index
    %0 = vector.load %arg1[%c0, %c0_0] : memref<2x128xf32, #tpu.memory_space<vmem>>, vector<1x128xf32>
    %c0_1 = arith.constant 0 : index
    %1 = memref.load %arg2[%c0_1] : memref<2xf32, #tpu.memory_space<smem>>
    %2 = vector.broadcast %1 : f32 to vector<1x128xf32>
    %3 = arith.mulf %0, %2 : vector<1x128xf32>
    %c1 = arith.constant 1 : index
    %c0_2 = arith.constant 0 : index
    %4 = vector.load %arg1[%c1, %c0_2] : memref<2x128xf32, #tpu.memory_space<vmem>>, vector<1x128xf32>
    %c1_3 = arith.constant 1 : index
    %5 = memref.load %arg2[%c1_3] : memref<2xf32, #tpu.memory_space<smem>>
    %6 = vector.broadcast %5 : f32 to vector<1x128xf32>
    %7 = arith.mulf %4, %6 : vector<1x128xf32>
    %8 = arith.addf %3, %7 : vector<1x128xf32>
    %c0_4 = arith.constant 0 : index
    %9 = memref.load %arg3[%c0_4] : memref<1xf32, #tpu.memory_space<smem>>
    %10 = vector.broadcast %9 : f32 to vector<1x128xf32>
    %11 = arith.addf %8, %10 : vector<1x128xf32>
    %c0_5 = arith.constant 0 : index
    %c0_6 = arith.constant 0 : index
    %12 = vector.load %arg4[%c0_5, %c0_6] : memref<1x128xf32, #tpu.memory_space<vmem>>, vector<1x128xf32>
    tpu.vector_store %arg4[%c0_5, %c0_6], %11 {strides = array<i32>} : memref<1x128xf32, #tpu.memory_space<vmem>>, vector<1x128xf32>,
    return
  }
  func.func @transform_0(%arg0: i32) -> (i32, i32) {
    %c0_i32 = arith.constant 0 : i32
    %c0_i32_0 = arith.constant 0 : i32
    return %c0_i32, %arg0 : i32, i32
  }
  func.func @transform_1(%arg0: i32) -> i32 {
    %c0_i32 = arith.constant 0 : i32
    %c0_i32_0 = arith.constant 0 : i32
    return %c0_i32 : i32
  }
  func.func @transform_2(%arg0: i32) -> i32 {
    %c0_i32 = arith.constant 0 : i32
    %c0_i32_0 = arith.constant 0 : i32
    return %c0_i32 : i32
  }
  func.func @transform_3(%arg0: i32) -> (i32, i32) {
    %c0_i32 = arith.constant 0 : i32
    %c0_i32_0 = arith.constant 0 : i32
    return %c0_i32, %arg0 : i32, i32
  }
}

</mosaic_0001>

<bundles_post_ra>
// kernel: tpu_custom_call.1
= control target key start
LH: loop header
LB: loop body
LE: loop exit
PB: predicated region body
PF: predicated region fallthrough
CT: control target
= control target key end

     0   :  { %s686_s0 = inlined_call_operand.hbm [shape: f32[2,256], index: 0, kind: input, shape index: {}]   ;;  %s687_s1 = inlined_call_operand.vmem [shape: f32[2], index: 1, kind: input, shape index: {}]   ;;  %s688_s2 = inlined_call_operand.<no memory space> [shape: f32[1], index: 2, kind: input, shape index: {}]   ;;  %s689_s3 = inlined_call_operand.hbm [shape: f32[1,256], index: 3, kind: output, shape index: {}]  }
   0x1   :  { %8 = sst [smem:[#allocation2]] %s688_s2 }
   0x2   :  { %9 = vsyncpa [#allocation4], 0 }
   0x3   :  { %11 = vsyncpa [#allocation4 + $0x1], 0 }
   0x4   :  { %12 = vsyncpa [#allocation6], 0 }
   0x5   :  { %13 = vsyncpa [#allocation5], 0 }
   0x6   :  { %15 = vsyncpa [#allocation5 + $0x1], 0  ;;  %s513_s14 = smov 0   ;;  %s515_s15 = smov 0  }
   0x7   :  { %s517_s16 = smov 0   ;;  %s519_s17 = smov 0  }
   0x8 LB: > { %s534_s2 = sadd.s32 4294967295, %s485_s17   ;;  %s304_s18 = sadd.s32 4294967294, %s485_s17   ;;  %s485_s17 = sphi %s519_s17, %s712_s17   ;;  %s481_s16 = sphi %s517_s16, %s711_s16   ;;  %s477_s15 = sphi %s515_s15, %s710_s15   ;;  %s473_s14 = sphi %s513_s14, %s709_s14  }
   0x9   : > { %p41_p0 = scmp.ne.s32.totalorder %s477_s15, %s473_s14  ;;  %p690_p1 = scmp.eq.s32.totalorder %s534_s2, 0 }
   0xa   : > { %p113_p3 = scmp.eq.s32.totalorder %s304_s18, 1  ;;  %p305_p5 = scmp.ge.s32.totalorder %s485_s17, 1 }
   0xb   : > { %p543_p4 = por %p690_p1, %p41_p0  ;;  %p120_p7 = scmp.lt.s32.totalorder %s485_s17, 3 }
   0xc   : > { %p548_p6 = por %p113_p3, %p41_p0  ;;  %s133_s23 = sshll.u32 %s687_s1, 4  ;;  %s134_s23 = int_to_ptr.vmem [resolvable:$true] %s133_s23 }
   0xd   : > { %s694_s19 = scalar_select %p543_p4, 1, 0 }
   0xe   : > { %s695_s20 = scalar_select %p548_p6, 1, 0 }
   0xf   : > { %p556_p8 = pnand %p305_p5, %p120_p7  ;;  %s564_s25 = sadd.s32 1, %s485_s17  }
  0x10   : > { %s25_s27 = ssub.s32 %s485_s17, %s564_s25  ;;  %s28_s29 = sadd.s32 1, %s481_s16 }
  0x11   : > { %s696_s24 = scalar_select %p556_p8, 1, 0 }
  0x12   : > { %p325_p10 = pneg %p556_p8  ;;  %p574_p12 = scmp.eq.s32.totalorder %s25_s27, 0 }
  0x13   : > { %p35_p13 = scmp.ne.s32.totalorder %s481_s16, %s477_s15  ;;  %s374_s30 = scalar_lea.vmem %s134_s23, 16 }
  0x14   : > { %p568_p11 = pnand %p325_p10, %p690_p1  ;;  %p375_p0 = scmp.ne.s32.totalorder %s134_s23, %s374_s30 }
  0x15   : > { %p382_p9 = scmp.lt.s32.totalorder %s134_s23, %s134_s23  ;;  %p383_p2 = scmp.lt.s32.totalorder %s374_s30, %s374_s30 }
  0x16   : > { %p376_p3 = pneg %p568_p11 }
  0x17   : > { %p384_p10 = por %p383_p2, %p382_p9 }
  0x18   : > { %p377_p5 = pnand %p376_p3, %p375_p0 }
  0x1a   : > { %p378_p7 = pneg %p377_p5 }
  0x1c   : > { %p385_p1 = pnand %p384_p10, %p378_p7 }
  0x1e   : > { %388 = shalt.err (!%p385_p1)
}
  0x1f   : > { %s487_s4 = smov [#allocation7]   ;;  %p36_p2 = scmp.eq.s32.totalorder %s485_s17, 0 }
  0x20   : > { %328 = dma.vmem_to_smem (!%p568_p11), %s134_s23, 16, %s487_s4, [#allocation6]  }
  0x21   : > { %s588_s5 = scalar_select %p574_p12, %s481_s16, %s28_s29  }
  0x22   : > { %p699_p1 = scmp.eq.s32.totalorder %s534_s2, 1  ;;  %p338_p0 = scmp.lt.s32.totalorder %s485_s17, 2 }
  0x23   : > { %s147_s7 = sand.u32 1, %s481_s16   ;;  %p37_p3 = por %p36_p2, %p35_p13 }
  0x24   : > { %p596_p9 = por %p699_p1, %p35_p13  ;;  %s308_s8 = sshll.u32 %s147_s7, 1 }
  0x25   : > { %s309_s9 = sshll.u32 %s485_s17, 5  ;;  %s151_s13 = scalar_lea.vmem [#allocation3], %s308_s8 }
  0x26   : > { %s700_s6 = scalar_select %p596_p9, 1, 0 }
  0x27   : > { %s609_s12 = scalar_lea.hbm %s686_s0, %s309_s9  ;;  %s158_s18 = sshll.u32 %s151_s13, 4  ;;  %s159_s18 = int_to_ptr.vmem [resolvable:$true] %s158_s18 }
  0x28   : > { %p611_p11 = pnand %p338_p0, %p37_p3  ;;  %s148_s22 = scalar_lea.sflag [#allocation4], %s147_s7 }
  0x29   : > { %s389_s23 = scalar_lea.hbm %s609_s12, 32  ;;  %s394_s28 = scalar_lea.hbm %s686_s0, 64 }
  0x2a   : > { %p390_p12 = scmp.ne.s32.totalorder %s609_s12, %s389_s23  ;;  %p391_p13 = pneg %p611_p11 }
  0x2b   : > { %p395_p10 = scmp.lt.s32.totalorder %s609_s12, %s686_s0  ;;  %p396_p2 = scmp.lt.s32.totalorder %s394_s28, %s389_s23 }
  0x2c   : > { %p392_p5 = pnand %p391_p13, %p390_p12 }
  0x2d   : > { %p397_p1 = por %p396_p2, %p395_p10 }
  0x2e   : > { %p393_p7 = pneg %p392_p5 }
  0x30   : > { %p398_p0 = pnand %p397_p1, %p393_p7 }
  0x32   : > { %401 = shalt.err (!%p398_p0)
}
  0x33   : > { %s402_s4 = scalar_lea.vmem %s159_s18, 32  ;;  %s488_s7 = smov [#allocation3]  }
  0x34   : > { %p403_p3 = scmp.ne.s32.totalorder %s159_s18, %s402_s4  ;;  %s407_s8 = sshll.u32 %s488_s7, 4  ;;  %s408_s8 = int_to_ptr.vmem [resolvable:$false] %s407_s8 }
  0x35   : > { %s409_s9 = scalar_lea.vmem %s408_s8, 64  ;;  %p410_p12 = scmp.lt.s32.totalorder %s159_s18, %s408_s8 }
  0x36   : > { %p405_p6 = pnand %p403_p3, %p391_p13  ;;  %p411_p5 = scmp.lt.s32.totalorder %s409_s9, %s402_s4 }
  0x38   : > { %p406_p9 = pneg %p405_p6  ;;  %p412_p4 = por %p411_p5, %p410_p12 }
  0x3a   : > { %p413_p8 = pnand %p412_p4, %p406_p9 }
  0x3c   : > { %416 = shalt.err (!%p413_p8)
}
  0x3d   : > { %332 = dma.hbm_to_vmem [thread:$0]  (!%p611_p11), %s609_s12, 32, %s159_s18, %s148_s22  }
  0x3e   : > { %p702_p7 = scmp.ne.s32.totalorder %s696_s24, 0 }
  0x3f   : > { %s632_s10 = sand.u32 (!%p702_p7), 1, %s477_s15   ;;  %p703_p6 = scmp.ne.s32.totalorder (!%p702_p7), %s694_s19, 0 }
  0x40   : > { %167 = sbr.rel (%p702_p7) target bundleno = 103 (0x67), region = 32  ;;  %s311_s11 = sshll.u32 (!%p702_p7), %s632_s10, 1 }
  0x41   : > { %s170_s13 = scalar_lea.sflag (!%p702_p7), [#allocation4], %s632_s10  ;;  %s173_s23 = scalar_lea.vmem (!%p702_p7), [#allocation3], %s311_s11 }
  0x45   : > { %460 = dma.done.wait (%p703_p6), %s170_s13, 32  }
  0x46   : > { %462 = vsyncadd (%p703_p6), %s170_s13, 4294967264  ;;  %p704_p4 = scmp.eq.s32.totalorder %s534_s2, 0 }
  0x48   : > { %464 = dma.done.wait (%p704_p4), [#allocation6], 16   ;;  %p705_p8 = pmov %p704_p4 }
  0x4a   : > { %466 = vsyncadd (%p705_p8), [#allocation6], 4294967280 }
  0x4b   : > { %182 = sfence }
  0x4c   : > { %s201_s24 = sld [smem:[#allocation7]]  ;;  %v200_v0 = vld [vmem:[%s173_s23] sm:$0x1]  ;;  %v204_v1 = vld [vmem:[%s173_s23 + $0x1] sm:$0x1]  ;;  %s199_s19 = scalar_lea.vmem [#allocation8], %s632_s10 }
  0x4d   : > { %s313_s12 = sld [smem:[#allocation7 + $0x1]]  ;;  %s226_s21 = sshll.u32 %s199_s19, 4  ;;  %s646_s21 = int_to_ptr.vmem [resolvable:$true] %s226_s21 }
  0x4e   : > { %s209_s18 = sld [smem:[#allocation2]]  ;;  %s314_s22 = sshll.u32 %s534_s2, 4 }
  0x4f   : > { %s224_s28 = scalar_lea.hbm %s689_s3, %s314_s22  ;;  %s214_s29 = scalar_lea.sflag [#allocation5], %s632_s10 }
  0x50   : > { %s417_s30 = scalar_lea.vmem %s646_s21, 16  ;;  %p706_p11 = scmp.ne.s32.totalorder %s700_s6, 0 }
  0x51   : > { %p418_p9 = scmp.ne.s32.totalorder %s646_s21, %s417_s30  ;;  %s489_s4 = smov [#allocation8]  }
  0x52   : > { %v202_v2 = vstv %s201_s24  ;;  %s421_s2 = sshll.u32 %s489_s4, 4  ;;  %s422_s2 = int_to_ptr.vmem [resolvable:$false] %s421_s2 }
  0x53   : > { %v203_v3 = vmul.f32 %v202_v2, %v200_v0  ;;  %v206_v4 = vstv %s313_s12  ;;  %p419_p13 = pnand %p418_p9, %p706_p11  ;;  %s423_s7 = scalar_lea.vmem %s422_s2, 32 }
  0x54   : > { %v207_v5 = vmul.f32 %v206_v4, %v204_v1  ;;  %v210_v6 = vstv %s209_s18  ;;  %p424_p2 = scmp.lt.s32.totalorder %s646_s21, %s422_s2  ;;  %p425_p1 = scmp.lt.s32.totalorder %s423_s7, %s417_s30 }
  0x55   : > { %p420_p10 = pneg %p419_p13 }
  0x56   : > { %v208_v7 = vadd.f32 %v207_v5, %v203_v3  ;;  %p426_p0 = por %p425_p1, %p424_p2 }
  0x58   : > { %v211_v8 = vadd.f32 %v210_v6, %v208_v7  ;;  %p427_p3 = pnand %p426_p0, %p420_p10 }
  0x5a   : > { %212 = vst [vmem:[%s199_s19] sm:$0x1] %v211_v8 }
  0x5b   : > { %430 = shalt.err (!%p427_p3)
}
  0x5c   : > { %s431_s8 = scalar_lea.hbm %s224_s28, 16  ;;  %s435_s11 = scalar_lea.hbm %s689_s3, 32 }
  0x5d   : > { %p432_p12 = scmp.ne.s32.totalorder %s224_s28, %s431_s8  ;;  %p436_p6 = scmp.lt.s32.totalorder %s224_s28, %s689_s3 }
  0x5e   : > { %p437_p4 = scmp.lt.s32.totalorder %s435_s11, %s431_s8 }
  0x5f   : > { %p433_p5 = pnand %p432_p12, %p706_p11 }
  0x60   : > { %p438_p8 = por %p437_p4, %p436_p6 }
  0x61   : > { %p434_p7 = pneg %p433_p5 }
  0x63   : > { %p439_p9 = pnand %p438_p8, %p434_p7 }
  0x65   : > { %442 = shalt.err (!%p439_p9)
}
  0x66   : > { %323 = dma.vmem_to_hbm [thread:$0]  (%p706_p11), %s646_s21, 16, %s224_s28, %s214_s29  }
  0x67 PF: > { %s238_s24 = sand.u32 1, %s473_s14   ;;  %p707_p13 = scmp.ne.s32.totalorder %s695_s20, 0 }
  0x68   : > { %p708_p10 = scmp.ge.s32.totalorder %s485_s17, 2  ;;  %s239_s12 = scalar_lea.sflag [#allocation5], %s238_s24 }
  0x6a   : > { %p334_p2 = pnand %p708_p10, %p707_p13 }
  0x6c   : > { %p335_p1 = pneg %p334_p2 }
  0x6e   : > { %468 = dma.done.wait (%p335_p1), %s239_s12, 16  }
  0x6f   : > { %470 = vsyncadd (%p335_p1), %s239_s12, 4294967280  ;;  %p18_p0 = scmp.ge.s32.totalorder %s564_s25, 4   ;;  %s709_s14 = smov %s477_s15 }
  0x70   : > { %s710_s15 = smov %s481_s16  ;;  %s711_s16 = smov %s588_s5 }
  0x71   : > { %s712_s17 = smov %s564_s25  ;;  %20 = sbr.rel (!%p18_p0) target bundleno = 8 (0x8), region = 82 }
  0x76   :  { %243 = vsyncpa [#allocation4], 1 }
  0x77   :  { %245 = vsyncpa [#allocation4 + $0x1], 1 }
  0x78   :  { %246 = vsyncpa [#allocation5], 1 }
  0x79   :  { %248 = vsyncpa [#allocation5 + $0x1], 1 }
  0x7a   :  { %249 = vsyncpa [#allocation6], 1 }
  0x7b   :  { %251 = vsyncpa [#allocation6 + $0x1], 1 }

</bundles_post_ra>
